<compile_context>
chip_gen: v6e
topology: v6e:2x2x1
jax: 0.10.0
libtpu: 0.0.40
codegen_flags: <defaults>
</compile_context>

<pallas_src>
import math
import functools

import jax
import jax.numpy as jnp
from jax.experimental import pallas as pl
from jax.experimental.pallas import tpu as pltpu


def _round_up(x, m):
    return (x + m - 1) // m * m


# ----------------------------- hardware probing ------------------------------
def _vmem_capacity_bytes():
    """Physical VMEM per TensorCore; conservative fallback (64 MiB = v7x)."""
    try:
        cap = int(pltpu.get_tpu_info().vmem_capacity_bytes)
        if cap > 0:
            return cap
    except Exception:
        pass
    return 64 * 1024 * 1024


_VMEM_CAP = _vmem_capacity_bytes()
# Scoped-VMEM limit handed to Mosaic: far above the ~16/32 MiB defaults, with
# headroom below physical (v5e/v6e -> 96 MiB, v7x -> 48 MiB).
_VMEM_LIMIT_BYTES = int(min(3 * _VMEM_CAP // 4, 100 * 1024 * 1024))
# Budget for the fully fused (weights-resident) path; weights are single
# buffered (pl.Buffered(1)) so they are counted once.
_FUSED_VMEM_BUDGET_BYTES = int(min(_VMEM_CAP // 2, 56 * 1024 * 1024))


def _tiled_tile_defaults():
    """Per-generation (tm, tn, tk) for the large-shape tiled kernel."""
    if _VMEM_CAP >= 96 * 1024 * 1024:       # v5e / v6e: 128 MiB VMEM
        return 512, 1024, 1024              # tm/tn multiples of 256 for the MXU
    return 512, 512, 1024                   # v7x: 64 MiB VMEM -> smaller footprint


# --------------------------------- activation --------------------------------
def _gelu(y, approximate=False):
    if approximate:
        # tanh approximation lowers to EUP ops (cheap under MXU work); gated
        # behind a flag because torch.nn.GELU() default is the exact erf form.
        return jax.nn.gelu(y, approximate=True)
    inv_sqrt2 = jnp.float32(1.0 / math.sqrt(2.0))
    return 0.5 * y * (1.0 + jax.lax.erf(y * inv_sqrt2))


# --------------------- fused whole-MLP kernel (small/medium MLPs) ------------
def _fused_mlp_kernel(*refs, n_layers, compute_dtype, approximate_gelu):
    # refs = (x_ref, w0_ref, b0_ref, w1_ref, b1_ref, ..., o_ref)
    x_ref = refs[0]
    o_ref = refs[1 + 2 * n_layers]
    h = x_ref[...]
    for l in range(n_layers):
        w = refs[1 + 2 * l][...]
        b = refs[2 + 2 * l][...]                     # bias kept in f32
        h = jnp.dot(h.astype(compute_dtype), w,
                    preferred_element_type=jnp.float32) + b
        if l != n_layers - 1:                        # no activation after last layer
            h = _gelu(h, approximate_gelu)
    o_ref[...] = h.astype(o_ref.dtype)


def fused_mlp_pallas(x2d, params, *, tm, compute_dtype=jnp.float32,
                     approximate_gelu=False, single_buffer_weights=True):
    """Whole MLP in a single pallas_call; weights/biases VMEM-resident."""
    M, K = x2d.shape
    n_layers = len(params)
    n_out = params[-1][0].shape[1]

    Mp = _round_up(max(M, 1), tm)
    xp = x2d if Mp == M else jnp.pad(x2d, ((0, Mp - M), (0, 0)))
    xp = xp.astype(compute_dtype)

    itemsize = jnp.dtype(compute_dtype).itemsize
    operands = [xp]
    flops = 0
    transcendentals = 0
    bytes_accessed = xp.size * itemsize + Mp * n_out * x2d.dtype.itemsize
    for li, (w, b) in enumerate(params):
        kl, nl = w.shape
        operands.append(w.astype(compute_dtype))
        operands.append(b.reshape(1, nl).astype(jnp.float32))
        flops += 2 * Mp * kl * nl
        if li != n_layers - 1:
            transcendentals += Mp * nl
        bytes_accessed += w.size * itemsize + b.size * 4

    def build_specs(use_single_buffer):
        specs = [pl.BlockSpec((tm, K), lambda i: (i, 0))]
        for (w, b) in params:
            kl, nl = w.shape
            if use_single_buffer:
                # index_map is constant -> double-buffering these buys nothing;
                # single buffer halves the resident weight VMEM (matters on v7x).
                specs.append(pl.BlockSpec((kl, nl), lambda i: (0, 0),
                                          pipeline_mode=pl.Buffered(1)))
                specs.append(pl.BlockSpec((1, nl), lambda i: (0, 0),
                                          pipeline_mode=pl.Buffered(1)))
            else:
                specs.append(pl.BlockSpec((kl, nl), lambda i: (0, 0)))
                specs.append(pl.BlockSpec((1, nl), lambda i: (0, 0)))
        return specs

    kernel = functools.partial(_fused_mlp_kernel, n_layers=n_layers,
                               compute_dtype=compute_dtype,
                               approximate_gelu=approximate_gelu)

    def run(use_single_buffer):
        return pl.pallas_call(
            kernel,
            out_shape=jax.ShapeDtypeStruct((Mp, n_out), x2d.dtype),
            grid_spec=pltpu.PrefetchScalarGridSpec(
                num_scalar_prefetch=0,
                grid=(Mp // tm,),
                in_specs=build_specs(use_single_buffer),
                out_specs=pl.BlockSpec((tm, n_out), lambda i: (i, 0)),
            ),
            compiler_params=pltpu.CompilerParams(
                dimension_semantics=("parallel",),       # shard row tiles (v7x 2 TCs)
                vmem_limit_bytes=_VMEM_LIMIT_BYTES),
            cost_estimate=pl.CostEstimate(
                flops=flops, transcendentals=transcendentals,
                bytes_accessed=bytes_accessed),
        )(*operands)

    if single_buffer_weights:
        try:
            out = run(True)
        except Exception:
            out = run(False)    # graceful fallback if Buffered(1) is rejected
    else:
        out = run(False)
    return out[:M]


# --------------------- general tiled linear (large shapes) -------------------
def _tiled_linear_kernel(x_ref, w_ref, b_ref, o_ref, acc_ref, *,
                         apply_gelu, approximate_gelu):
    k = pl.program_id(2)

    @pl.when(k == 0)
    def _():
        acc_ref[...] = jnp.zeros_like(acc_ref)

    acc_ref[...] += jnp.dot(x_ref[...], w_ref[...],
                            preferred_element_type=jnp.float32)

    @pl.when(k == pl.num_programs(2) - 1)
    def _():
        y = acc_ref[...] + b_ref[...]          # bias + activation only at finalize
        if apply_gelu:
            y = _gelu(y, approximate_gelu)
        o_ref[...] = y.astype(o_ref.dtype)


def tiled_linear_pallas(x2d, w, b, *, apply_gelu, compute_dtype=jnp.float32,
                        approximate_gelu=False, tm=None, tn=None, tk=None):
    """gelu(x @ W + b) with a (parallel M, parallel N, arbitrary K) grid."""
    M, K = x2d.shape
    N = w.shape[1]
    dtm, dtn, dtk = _tiled_tile_defaults()
    tm = tm or dtm
    tn = tn or dtn
    tk = tk or dtk
    # Clamp tiles to the problem; use full-extent blocks for small dims so no
    # padding (and thus no extra HBM pass) is needed there.
    tm = min(tm, _round_up(max(M, 1), 8))
    tn = N if N <= tn else tn
    tk = K if K <= tk else tk
    Mp, Kp, Np = _round_up(M, tm), _round_up(K, tk), _round_up(N, tn)

    xp = x2d if (Mp, Kp) == (M, K) else jnp.pad(x2d, ((0, Mp - M), (0, Kp - K)))
    wp = w if (Kp, Np) == (K, N) else jnp.pad(w, ((0, Kp - K), (0, Np - N)))
    bp = (b if Np == N else jnp.pad(b, (0, Np - N))).reshape(1, Np)
    xp = xp.astype(compute_dtype)
    wp = wp.astype(compute_dtype)
    bp = bp.astype(jnp.float32)
    # NOTE: when a layer is called repeatedly (training loop under jit), the
    # wp/bp pad+cast should be hoisted to init so it happens once, not per call.

    kernel = functools.partial(_tiled_linear_kernel, apply_gelu=apply_gelu,
                               approximate_gelu=approximate_gelu)
    itemsize = jnp.dtype(compute_dtype).itemsize
    out = pl.pallas_call(
        kernel,
        out_shape=jax.ShapeDtypeStruct((Mp, Np), x2d.dtype),
        grid_spec=pltpu.PrefetchScalarGridSpec(
            num_scalar_prefetch=0,
            grid=(Mp // tm, Np // tn, Kp // tk),
            in_specs=[
                pl.BlockSpec((tm, tk), lambda i, j, k: (i, k)),
                pl.BlockSpec((tk, tn), lambda i, j, k: (k, j)),
                pl.BlockSpec((1, tn), lambda i, j, k: (0, j)),   # per-N-tile bias
            ],
            out_specs=pl.BlockSpec((tm, tn), lambda i, j, k: (i, j)),
            scratch_shapes=[pltpu.VMEM((tm, tn), jnp.float32)],
        ),
        compiler_params=pltpu.CompilerParams(
            dimension_semantics=("parallel", "parallel", "arbitrary"),
            vmem_limit_bytes=_VMEM_LIMIT_BYTES),
        cost_estimate=pl.CostEstimate(
            flops=2 * Mp * Kp * Np,
            transcendentals=(Mp * Np if apply_gelu else 0),
            bytes_accessed=(Mp * Kp * (Np // tn) + Kp * Np * (Mp // tm)) * itemsize
                           + (Np + Mp * Np) * 4),
    )(xp, wp, bp)
    return out[:M, :N]


# ------------------------------- MLP module ----------------------------------
def init_mlp_params(key, input_dim, hidden_dims):
    """Mimics torch.nn.Linear default init (uniform +-1/sqrt(fan_in))."""
    params = []
    last_dim = input_dim
    for nh in hidden_dims:
        key, kw, kb = jax.random.split(key, 3)
        bound = 1.0 / math.sqrt(last_dim)
        # store weight as (in, out) so the kernel does x @ W directly
        w = jax.random.uniform(kw, (last_dim, nh), jnp.float32, -bound, bound)
        b = jax.random.uniform(kb, (nh,), jnp.float32, -bound, bound)
        params.append((w, b))
        last_dim = nh
    return params


def mlp_forward(params, x, *, tm=256, compute_dtype=jnp.float32,
                approximate_gelu=False):
    """x: (..., input_dim).  Module defaults: norm_type=None, activation='gelu'."""
    lead_shape = x.shape[:-1]
    m = 1
    for d in lead_shape:
        m *= d
    x2d = x.reshape(m, x.shape[-1])
    M = x2d.shape[0]

    # Row-tile size: avoid padding tiny M up to 128; keep >=2 grid steps when
    # cheap so the 'parallel' axis can shard across v7x's two TensorCores.
    tm_eff = min(tm, _round_up(max(M, 1), 8))
    if (tm_eff == _round_up(max(M, 1), 8) and tm_eff >= 16
            and (tm_eff // 2) % 8 == 0):
        tm_eff //= 2

    # Fuse the whole MLP into one kernel when resident weights + streamed row
    # tiles + f32 intermediates fit the per-generation VMEM budget.
    itemsize = jnp.dtype(compute_dtype).itemsize
    max_width = max(w.shape[1] for w, _ in params)
    resident = sum(w.size * itemsize + b.size * 4 for w, b in params)
    streamed = 2 * tm_eff * (x2d.shape[1] * itemsize
                             + params[-1][0].shape[1] * x2d.dtype.itemsize)
    interm = 2 * tm_eff * max_width * 4
    if resident + streamed + interm <= _FUSED_VMEM_BUDGET_BYTES:
        out2d = fused_mlp_pallas(x2d, params, tm=tm_eff,
                                 compute_dtype=compute_dtype,
                                 approximate_gelu=approximate_gelu)
    else:
        out2d = x2d
        for i, (w, b) in enumerate(params):
            out2d = tiled_linear_pallas(out2d, w, b,
                                        apply_gelu=(i != len(params) - 1),
                                        compute_dtype=compute_dtype,
                                        approximate_gelu=approximate_gelu)
    return out2d.reshape(*lead_shape, out2d.shape[-1])


# TODO(synk): norm_type='group_norm' branch (GroupNorm over the transposed seq
# axis) is not exercised by the module defaults (norm_type=None); not implemented.


# ---------------------------------- main --------------------------------------
if __name__ == "__main__":
    key = jax.random.PRNGKey(0)
    k_in, k_params = jax.random.split(key)

    batch, seq, input_dim = 2, 8, 32
    hidden_dims = (128, 128)

    x = jax.random.normal(k_in, (batch, seq, input_dim), dtype=jnp.float32)
    params = init_mlp_params(k_params, input_dim, hidden_dims)

    # plain-JAX reference (exact erf GELU, matching torch.nn.GELU() default)
    ref2d = x.reshape(batch * seq, input_dim)
    for i, (w, b) in enumerate(params):
        ref2d = ref2d @ w + b
        if i != len(params) - 1:
            ref2d = jax.nn.gelu(ref2d, approximate=False)
    ref = ref2d.reshape(batch, seq, hidden_dims[-1])

    # 1) primary fused single-kernel path (f32, exact)
    out = jax.block_until_ready(mlp_forward(params, x))
    assert out.shape == (batch, seq, hidden_dims[-1])
    assert jnp.allclose(out, ref, atol=1e-5, rtol=1e-5)

    # 2) general tiled (large-shape) per-layer path (f32, exact)
    t = x.reshape(batch * seq, input_dim)
    for i, (w, b) in enumerate(params):
        t = tiled_linear_pallas(t, w, b, apply_gelu=(i != len(params) - 1))
    t = jax.block_until_ready(t)
    assert jnp.allclose(t, ref2d, atol=1e-5, rtol=1e-5)

    # 3) bf16 MXU-input option (f32 accumulate / bias / GELU epilogue) -- the
    #    recommended perf configuration for v6e/v7x; intentionally looser tol.
    out_bf16 = jax.block_until_ready(
        mlp_forward(params, x, compute_dtype=jnp.bfloat16))
    assert jnp.allclose(out_bf16, ref, atol=5e-2, rtol=5e-2)

    print("KERNEL_OK")
</pallas_src>

<mosaic_0001>
module attributes {stable_mosaic.version = 11 : i64} {
  func.func @_fused_mlp_kernel(%arg0: i32, %arg1: memref<8x32xf32, #tpu.memory_space<vmem>>, %arg2: memref<32x128xf32, #tpu.memory_space<vmem>>, %arg3: memref<1x128xf32, #tpu.memory_space<vmem>>, %arg4: memref<128x128xf32, #tpu.memory_space<vmem>>, %arg5: memref<1x128xf32, #tpu.memory_space<vmem>>, %arg6: memref<8x128xf32, #tpu.memory_space<vmem>>) attributes {dimension_semantics = [#tpu.dimension_semantics<parallel>], iteration_bounds = array<i64: 2>, scalar_prefetch = 0 : i64, scratch_operands = 0 : i64, tpu.core_type = #tpu.core_type<tc>, window_params = [{transform_indices = @transform_0, window_bounds = array<i64: 8, 32>}, {pipeline_mode = #tpu.pipeline_mode<synchronous>, transform_indices = @transform_1, window_bounds = array<i64: 32, 128>}, {pipeline_mode = #tpu.pipeline_mode<synchronous>, transform_indices = @transform_2, window_bounds = array<i64: 1, 128>}, {pipeline_mode = #tpu.pipeline_mode<synchronous>, transform_indices = @transform_3, window_bounds = array<i64: 128, 128>}, {pipeline_mode = #tpu.pipeline_mode<synchronous>, transform_indices = @transform_4, window_bounds = array<i64: 1, 128>}, {transform_indices = @transform_5, window_bounds = array<i64: 8, 128>}]} {
    %c0 = arith.constant 0 : index
    %c0_0 = arith.constant 0 : index
    %0 = vector.load %arg1[%c0, %c0_0] : memref<8x32xf32, #tpu.memory_space<vmem>>, vector<8x32xf32>
    %c0_1 = arith.constant 0 : index
    %c0_2 = arith.constant 0 : index
    %1 = vector.load %arg2[%c0_1, %c0_2] : memref<32x128xf32, #tpu.memory_space<vmem>>, vector<32x128xf32>
    %c0_3 = arith.constant 0 : index
    %c0_4 = arith.constant 0 : index
    %2 = vector.load %arg3[%c0_3, %c0_4] : memref<1x128xf32, #tpu.memory_space<vmem>>, vector<1x128xf32>
    %cst = arith.constant dense<0.000000e+00> : vector<8x128xf32>
    %3 = tpu.matmul %0, %1, %cst {dimension_numbers = #tpu.dot_dimension_numbers<[1], [0], [0], [1], [0, 0, 1, 1], [], []>} : vector<8x32xf32>, vector<32x128xf32>, vector<8x128xf32> -> vector<8x128xf32>
    %4 = vector.broadcast %2 : vector<1x128xf32> to vector<8x128xf32>
    %5 = arith.addf %3, %4 : vector<8x128xf32>
    %cst_5 = arith.constant 5.000000e-01 : f32
    %6 = vector.broadcast %cst_5 : f32 to vector<8x128xf32>
    %7 = arith.mulf %6, %5 : vector<8x128xf32>
    %cst_6 = arith.constant 0.707106769 : f32
    %8 = vector.broadcast %cst_6 : f32 to vector<8x128xf32>
    %9 = arith.mulf %5, %8 : vector<8x128xf32>
    %10 = math.erf %9 : vector<8x128xf32>
    %cst_7 = arith.constant 1.000000e+00 : f32
    %11 = vector.broadcast %cst_7 : f32 to vector<8x128xf32>
    %12 = arith.addf %11, %10 : vector<8x128xf32>
    %13 = arith.mulf %7, %12 : vector<8x128xf32>
    %c0_8 = arith.constant 0 : index
    %c0_9 = arith.constant 0 : index
    %14 = vector.load %arg4[%c0_8, %c0_9] : memref<128x128xf32, #tpu.memory_space<vmem>>, vector<128x128xf32>
    %c0_10 = arith.constant 0 : index
    %c0_11 = arith.constant 0 : index
    %15 = vector.load %arg5[%c0_10, %c0_11] : memref<1x128xf32, #tpu.memory_space<vmem>>, vector<1x128xf32>
    %cst_12 = arith.constant dense<0.000000e+00> : vector<8x128xf32>
    %16 = tpu.matmul %13, %14, %cst_12 {dimension_numbers = #tpu.dot_dimension_numbers<[1], [0], [0], [1], [0, 0, 1, 1], [], []>} : vector<8x128xf32>, vector<128x128xf32>, vector<8x128xf32> -> vector<8x128xf32>
    %17 = vector.broadcast %15 : vector<1x128xf32> to vector<8x128xf32>
    %18 = arith.addf %16, %17 : vector<8x128xf32>
    %c0_13 = arith.constant 0 : index
    %c0_14 = arith.constant 0 : index
    %19 = vector.load %arg6[%c0_13, %c0_14] : memref<8x128xf32, #tpu.memory_space<vmem>>, vector<8x128xf32>
    tpu.vector_store %arg6[%c0_13, %c0_14], %18 {strides = array<i32>} : memref<8x128xf32, #tpu.memory_space<vmem>>, vector<8x128xf32>,
    return
  }
  func.func @transform_0(%arg0: i32) -> (i32, i32) {
    %c0_i32 = arith.constant 0 : i32
    %c0_i32_0 = arith.constant 0 : i32
    return %arg0, %c0_i32 : i32, i32
  }
  func.func @transform_1(%arg0: i32) -> (i32, i32) {
    %c0_i32 = arith.constant 0 : i32
    %c0_i32_0 = arith.constant 0 : i32
    %c0_i32_1 = arith.constant 0 : i32
    return %c0_i32, %c0_i32_0 : i32, i32
  }
  func.func @transform_2(%arg0: i32) -> (i32, i32) {
    %c0_i32 = arith.constant 0 : i32
    %c0_i32_0 = arith.constant 0 : i32
    %c0_i32_1 = arith.constant 0 : i32
    return %c0_i32, %c0_i32_0 : i32, i32
  }
  func.func @transform_3(%arg0: i32) -> (i32, i32) {
    %c0_i32 = arith.constant 0 : i32
    %c0_i32_0 = arith.constant 0 : i32
    %c0_i32_1 = arith.constant 0 : i32
    return %c0_i32, %c0_i32_0 : i32, i32
  }
  func.func @transform_4(%arg0: i32) -> (i32, i32) {
    %c0_i32 = arith.constant 0 : i32
    %c0_i32_0 = arith.constant 0 : i32
    %c0_i32_1 = arith.constant 0 : i32
    return %c0_i32, %c0_i32_0 : i32, i32
  }
  func.func @transform_5(%arg0: i32) -> (i32, i32) {
    %c0_i32 = arith.constant 0 : i32
    %c0_i32_0 = arith.constant 0 : i32
    return %arg0, %c0_i32 : i32, i32
  }
}

module attributes {stable_mosaic.version = 11 : i64} {
  func.func @_fused_mlp_kernel(%arg0: i32, %arg1: memref<8x32xf32, #tpu.memory_space<vmem>>, %arg2: memref<32x128xf32, #tpu.memory_space<vmem>>, %arg3: memref<1x128xf32, #tpu.memory_space<vmem>>, %arg4: memref<128x128xf32, #tpu.memory_space<vmem>>, %arg5: memref<1x128xf32, #tpu.memory_space<vmem>>, %arg6: memref<8x128xf32, #tpu.memory_space<vmem>>) attributes {dimension_semantics = [#tpu.dimension_semantics<parallel>], iteration_bounds = array<i64: 2>, scalar_prefetch = 0 : i64, scratch_operands = 0 : i64, tpu.core_type = #tpu.core_type<tc>, window_params = [{transform_indices = @transform_0, window_bounds = array<i64: 8, 32>}, {pipeline_mode = #tpu.pipeline_mode<synchronous>, transform_indices = @transform_1, window_bounds = array<i64: 32, 128>}, {pipeline_mode = #tpu.pipeline_mode<synchronous>, transform_indices = @transform_2, window_bounds = array<i64: 1, 128>}, {pipeline_mode = #tpu.pipeline_mode<synchronous>, transform_indices = @transform_3, window_bounds = array<i64: 128, 128>}, {pipeline_mode = #tpu.pipeline_mode<synchronous>, transform_indices = @transform_4, window_bounds = array<i64: 1, 128>}, {transform_indices = @transform_5, window_bounds = array<i64: 8, 128>}]} {
    %c0 = arith.constant 0 : index
    %c0_0 = arith.constant 0 : index
    %0 = vector.load %arg1[%c0, %c0_0] : memref<8x32xf32, #tpu.memory_space<vmem>>, vector<8x32xf32>
    %c0_1 = arith.constant 0 : index
    %c0_2 = arith.constant 0 : index
    %1 = vector.load %arg2[%c0_1, %c0_2] : memref<32x128xf32, #tpu.memory_space<vmem>>, vector<32x128xf32>
    %c0_3 = arith.constant 0 : index
    %c0_4 = arith.constant 0 : index
    %2 = vector.load %arg3[%c0_3, %c0_4] : memref<1x128xf32, #tpu.memory_space<vmem>>, vector<1x128xf32>
    %cst = arith.constant dense<0.000000e+00> : vector<8x128xf32>
    %3 = tpu.matmul %0, %1, %cst {dimension_numbers = #tpu.dot_dimension_numbers<[1], [0], [0], [1], [0, 0, 1, 1], [], []>} : vector<8x32xf32>, vector<32x128xf32>, vector<8x128xf32> -> vector<8x128xf32>
    %4 = vector.broadcast %2 : vector<1x128xf32> to vector<8x128xf32>
    %5 = arith.addf %3, %4 : vector<8x128xf32>
    %cst_5 = arith.constant 5.000000e-01 : f32
    %6 = vector.broadcast %cst_5 : f32 to vector<8x128xf32>
    %7 = arith.mulf %6, %5 : vector<8x128xf32>
    %cst_6 = arith.constant 0.707106769 : f32
    %8 = vector.broadcast %cst_6 : f32 to vector<8x128xf32>
    %9 = arith.mulf %5, %8 : vector<8x128xf32>
    %10 = math.erf %9 : vector<8x128xf32>
    %cst_7 = arith.constant 1.000000e+00 : f32
    %11 = vector.broadcast %cst_7 : f32 to vector<8x128xf32>
    %12 = arith.addf %11, %10 : vector<8x128xf32>
    %13 = arith.mulf %7, %12 : vector<8x128xf32>
    %c0_8 = arith.constant 0 : index
    %c0_9 = arith.constant 0 : index
    %14 = vector.load %arg4[%c0_8, %c0_9] : memref<128x128xf32, #tpu.memory_space<vmem>>, vector<128x128xf32>
    %c0_10 = arith.constant 0 : index
    %c0_11 = arith.constant 0 : index
    %15 = vector.load %arg5[%c0_10, %c0_11] : memref<1x128xf32, #tpu.memory_space<vmem>>, vector<1x128xf32>
    %cst_12 = arith.constant dense<0.000000e+00> : vector<8x128xf32>
    %16 = tpu.matmul %13, %14, %cst_12 {dimension_numbers = #tpu.dot_dimension_numbers<[1], [0], [0], [1], [0, 0, 1, 1], [], []>} : vector<8x128xf32>, vector<128x128xf32>, vector<8x128xf32> -> vector<8x128xf32>
    %17 = vector.broadcast %15 : vector<1x128xf32> to vector<8x128xf32>
    %18 = arith.addf %16, %17 : vector<8x128xf32>
    %c0_13 = arith.constant 0 : index
    %c0_14 = arith.constant 0 : index
    %19 = vector.load %arg6[%c0_13, %c0_14] : memref<8x128xf32, #tpu.memory_space<vmem>>, vector<8x128xf32>
    tpu.vector_store %arg6[%c0_13, %c0_14], %18 {strides = array<i32>} : memref<8x128xf32, #tpu.memory_space<vmem>>, vector<8x128xf32>,
    return
  }
  func.func @transform_0(%arg0: i32) -> (i32, i32) {
    %c0_i32 = arith.constant 0 : i32
    %c0_i32_0 = arith.constant 0 : i32
    return %arg0, %c0_i32 : i32, i32
  }
  func.func @transform_1(%arg0: i32) -> (i32, i32) {
    %c0_i32 = arith.constant 0 : i32
    %c0_i32_0 = arith.constant 0 : i32
    %c0_i32_1 = arith.constant 0 : i32
    return %c0_i32, %c0_i32_0 : i32, i32
  }
  func.func @transform_2(%arg0: i32) -> (i32, i32) {
    %c0_i32 = arith.constant 0 : i32
    %c0_i32_0 = arith.constant 0 : i32
    %c0_i32_1 = arith.constant 0 : i32
    return %c0_i32, %c0_i32_0 : i32, i32
  }
  func.func @transform_3(%arg0: i32) -> (i32, i32) {
    %c0_i32 = arith.constant 0 : i32
    %c0_i32_0 = arith.constant 0 : i32
    %c0_i32_1 = arith.constant 0 : i32
    return %c0_i32, %c0_i32_0 : i32, i32
  }
  func.func @transform_4(%arg0: i32) -> (i32, i32) {
    %c0_i32 = arith.constant 0 : i32
    %c0_i32_0 = arith.constant 0 : i32
    %c0_i32_1 = arith.constant 0 : i32
    return %c0_i32, %c0_i32_0 : i32, i32
  }
  func.func @transform_5(%arg0: i32) -> (i32, i32) {
    %c0_i32 = arith.constant 0 : i32
    %c0_i32_0 = arith.constant 0 : i32
    return %arg0, %c0_i32 : i32, i32
  }
}

</mosaic_0001>

<bundles_post_ra>
// kernel: tpu_custom_call.1
= control target key start
LH: loop header
LB: loop body
LE: loop exit
PB: predicated region body
PF: predicated region fallthrough
CT: control target
= control target key end

     0   :  { %10 = vsyncpa [#allocation3], 0  ;;  %s1108_s0 = inlined_call_operand.hbm [shape: f32[16,32], index: 0, kind: input, shape index: {}]   ;;  %s1109_s1 = inlined_call_operand.hbm [shape: f32[32,128], index: 1, kind: input, shape index: {}]   ;;  %s1110_s2 = inlined_call_operand.vmem [shape: f32[1,128], index: 2, kind: input, shape index: {}]   ;;  %s1111_s3 = inlined_call_operand.hbm [shape: f32[128,128], index: 3, kind: input, shape index: {}]   ;;  %s1112_s4 = inlined_call_operand.vmem [shape: f32[1,128], index: 4, kind: input, shape index: {}]   ;;  %s1113_s5 = inlined_call_operand.hbm [shape: f32[16,128], index: 5, kind: output, shape index: {}]  }
   0x1   :  { %12 = vsyncpa [#allocation3 + $0x1], 0 }
   0x2   :  { %13 = vsyncpa [#allocation6], 0 }
   0x3   :  { %14 = vsyncpa [#allocation4], 0 }
   0x4   :  { %16 = vsyncpa [#allocation4 + $0x1], 0  ;;  %s905_s18 = smov 0   ;;  %s907_s19 = smov 0  }
   0x5   :  { %s909_s20 = smov 0   ;;  %s911_s21 = smov 0  }
   0x6 LB: > { %s926_s22 = sadd.s32 4294967295, %s865_s21   ;;  %s557_s23 = sadd.s32 4294967294, %s865_s21   ;;  %s865_s21 = sphi %s911_s21, %s1135_s21   ;;  %s861_s20 = sphi %s909_s20, %s1134_s20   ;;  %s857_s19 = sphi %s907_s19, %s1133_s19   ;;  %s853_s18 = sphi %s905_s18, %s1132_s18  }
   0x7   : > { %p42_p0 = scmp.ne.s32.totalorder %s857_s19, %s853_s18  ;;  %p1114_p1 = scmp.eq.s32.totalorder %s926_s22, 0 }
   0x8   : > { %p156_p3 = scmp.eq.s32.totalorder %s557_s23, 1  ;;  %p558_p5 = scmp.ge.s32.totalorder %s865_s21, 1 }
   0x9   : > { %p935_p4 = por %p1114_p1, %p42_p0  ;;  %p163_p7 = scmp.lt.s32.totalorder %s865_s21, 3 }
   0xa   : > { %p940_p6 = por %p156_p3, %p42_p0  ;;  %s867_s27 = smov [#allocation5]  }
   0xb   : > { %s1118_s24 = scalar_select %p935_p4, 1, 0 }
   0xc   : > { %s1119_s25 = scalar_select %p940_p6, 1, 0 }
   0xd   : > { %p945_p8 = pnand %p558_p5, %p163_p7  ;;  %s175_s28 = sshll.u32 %s867_s27, 4  ;;  %s176_s28 = int_to_ptr.vmem [resolvable:$true] %s175_s28 }
   0xe   : > { %s868_s30 = smov [#allocation7]   ;;  %s728_s7 = scalar_lea.vmem %s176_s28, 512 }
   0xf   : > { %s1120_s26 = scalar_select %p945_p8, 1, 0 }
  0x10   : > { %p656_p9 = pneg %p945_p8  ;;  %s191_s6 = sshll.u32 %s868_s30, 4  ;;  %s192_s6 = int_to_ptr.vmem [resolvable:$true] %s191_s6 }
  0x11   : > { %p729_p13 = scmp.ne.s32.totalorder %s176_s28, %s728_s7  ;;  %p736_p5 = scmp.lt.s32.totalorder %s176_s28, %s176_s28 }
  0x12   : > { %p954_p11 = pnand %p656_p9, %p1114_p1  ;;  %p737_p7 = scmp.lt.s32.totalorder %s728_s7, %s728_s7 }
  0x14   : > { %p719_p12 = pneg %p954_p11  ;;  %p738_p10 = por %p737_p7, %p736_p5 }
  0x16   : > { %p731_p0 = pnand %p729_p13, %p719_p12 }
  0x18   : > { %p732_p3 = pneg %p731_p0 }
  0x1a   : > { %p739_p9 = pnand %p738_p10, %p732_p3 }
  0x1c   : > { %742 = shalt.err (!%p739_p9)
}
  0x1d   : > { %s869_s8 = smov 128   ;;  %s870_s9 = smov 8  }
  0x1e   : > { %659 = dma.hbm_to_vmem [thread:$0]  (!%p954_p11), %s1109_s1, 512, %s176_s28, [#allocation6], %s869_s8, %s869_s8, %s870_s9  }
  0x1f   : > { %s754_s12 = scalar_lea.vmem %s192_s6, 2048  ;;  %p762_p2 = scmp.lt.s32.totalorder %s192_s6, %s192_s6 }
  0x20   : > { %p755_p1 = scmp.ne.s32.totalorder %s192_s6, %s754_s12  ;;  %p763_p6 = scmp.lt.s32.totalorder %s754_s12, %s754_s12 }
  0x22   : > { %p757_p13 = pnand %p755_p1, %p719_p12  ;;  %p764_p5 = por %p763_p6, %p762_p2 }
  0x24   : > { %p758_p0 = pneg %p757_p13 }
  0x26   : > { %p765_p10 = pnand %p764_p5, %p758_p0 }
  0x28   : > { %768 = shalt.err (!%p765_p10)
}
  0x29   : > { %662 = dma.hbm_to_vmem [thread:$0]  (!%p954_p11), %s1111_s3, 2048, %s192_s6, [#allocation6], %s869_s8, %s869_s8, %s870_s9  }
  0x2a   : > { %s977_s15 = sadd.s32 1, %s865_s21   ;;  %s29_s16 = sadd.s32 1, %s861_s20 }
  0x2b   : > { %s26_s17 = ssub.s32 %s865_s21, %s977_s15  ;;  %p36_p1 = scmp.ne.s32.totalorder %s861_s20, %s857_s19 }
  0x2c   : > { %p27_p2 = scmp.eq.s32.totalorder %s26_s17, 0  ;;  %p37_p6 = scmp.eq.s32.totalorder %s865_s21, 0 }
  0x2d   : > { %p1122_p12 = scmp.eq.s32.totalorder %s926_s22, 1  ;;  %p673_p7 = scmp.lt.s32.totalorder %s865_s21, 2 }
  0x2e   : > { %s993_s27 = scalar_select %p27_p2, %s861_s20, %s29_s16  }
  0x2f   : > { %p987_p3 = por %p1122_p12, %p36_p1  ;;  %p38_p9 = por %p37_p6, %p36_p1 }
  0x30   : > { %s208_s28 = sand.u32 1, %s861_s20   ;;  %s563_s30 = sshll.u32 %s865_s21, 7 }
  0x31   : > { %s1123_s23 = scalar_select %p987_p3, 1, 0 }
  0x32   : > { %s562_s29 = sshll.u32 %s208_s28, 3  ;;  %s1000_s8 = scalar_lea.hbm %s1108_s0, %s563_s30 }
  0x33   : > { %s212_s9 = scalar_lea.vmem [#allocation2], %s562_s29  ;;  %p1002_p11 = pnand %p673_p7, %p38_p9 }
  0x34   : > { %s219_s10 = sshll.u32 %s212_s9, 4  ;;  %s209_s12 = scalar_lea.sflag [#allocation3], %s208_s28  ;;  %s220_s10 = int_to_ptr.vmem [resolvable:$true] %s219_s10 }
  0x35   : > { %s769_s13 = scalar_lea.hbm %s1000_s8, 128  ;;  %p771_p0 = pneg %p1002_p11 }
  0x36   : > { %p770_p13 = scmp.ne.s32.totalorder %s1000_s8, %s769_s13  ;;  %s774_s17 = scalar_lea.hbm %s1108_s0, 256 }
  0x37   : > { %p775_p1 = scmp.lt.s32.totalorder %s1000_s8, %s1108_s0  ;;  %p776_p2 = scmp.lt.s32.totalorder %s774_s17, %s769_s13 }
  0x38   : > { %p772_p5 = pnand %p771_p0, %p770_p13 }
  0x39   : > { %p777_p6 = por %p776_p2, %p775_p1 }
  0x3a   : > { %p773_p10 = pneg %p772_p5 }
  0x3c   : > { %p778_p12 = pnand %p777_p6, %p773_p10 }
  0x3e   : > { %781 = shalt.err (!%p778_p12)
}
  0x3f   : > { %s782_s6 = scalar_lea.vmem %s220_s10, 128  ;;  %s871_s28 = smov [#allocation2]  }
  0x40   : > { %p783_p7 = scmp.ne.s32.totalorder %s220_s10, %s782_s6  ;;  %s787_s7 = sshll.u32 %s871_s28, 4  ;;  %s788_s7 = int_to_ptr.vmem [resolvable:$false] %s787_s7 }
  0x41   : > { %s789_s9 = scalar_lea.vmem %s788_s7, 256  ;;  %p790_p13 = scmp.lt.s32.totalorder %s220_s10, %s788_s7 }
  0x42   : > { %p785_p9 = pnand %p783_p7, %p771_p0  ;;  %p791_p5 = scmp.lt.s32.totalorder %s789_s9, %s782_s6 }
  0x44   : > { %p786_p3 = pneg %p785_p9  ;;  %p792_p4 = por %p791_p5, %p790_p13 }
  0x46   : > { %p793_p8 = pnand %p792_p4, %p786_p3 }
  0x48   : > { %796 = shalt.err (!%p793_p8)
}
  0x49   : > { %666 = dma.hbm_to_vmem [thread:$0]  (!%p1002_p11), %s1000_s8, 128, %s220_s10, %s209_s12  }
  0x4a   : > { %p1125_p10 = scmp.ne.s32.totalorder %s1120_s26, 0 }
  0x4b   : > { %s1023_s13 = sand.u32 (!%p1125_p10), 1, %s857_s19   ;;  %p1126_p4 = scmp.ne.s32.totalorder (!%p1125_p10), %s1118_s24, 0 }
  0x4c   : > { %228 = sbr.rel (%p1125_p10) target bundleno = 518 (0x206), region = 40  ;;  %s565_s14 = sshll.u32 (!%p1125_p10), %s1023_s13, 3 }
  0x4d   : > { %s231_s16 = scalar_lea.sflag (!%p1125_p10), [#allocation3], %s1023_s13  ;;  %s234_s17 = scalar_lea.vmem (!%p1125_p10), [#allocation2], %s565_s14 }
  0x51   : > { %840 = dma.done.wait (%p1126_p4), %s231_s16, 128  }
  0x52   : > { %842 = vsyncadd (%p1126_p4), %s231_s16, 4294967168  ;;  %p1127_p8 = scmp.eq.s32.totalorder %s926_s22, 0 }
  0x54   : > { %844 = dma.done.wait (%p1127_p8), [#allocation6], 2560   ;;  %p1128_p3 = pmov %p1127_p8 }
  0x55   : > { %v872_v0 = vmov 0.0   ;;  %vm873_vm0 = vmmov 0   ;;  %v273_v1 = vld [vmem:[#allocation5 + $0x18] sm:$0xff]  ;;  %v272_v2 = vld [vmem:[#allocation5 + $0x10] sm:$0xff]  ;;  %v271_v4 = vld [vmem:[#allocation5 + $0x8] sm:$0xff]  ;;  %vm281_vm1 = vcmask 261120  }
  0x56   : > { %846 = vsyncadd (%p1128_p3), [#allocation6], 4294964736  ;;  %598 = vmatprep.subr.mxu0 %v872_v0  ;;  %606 = vmatprep.mubr.msk.f32.mxu0 %vm873_vm0, %v872_v0  ;;  %v375_v3 = vld [vmem:[#allocation7 + $0x78] sm:$0xff]  ;;  %v374_v5 = vld [vmem:[#allocation7 + $0x70] sm:$0xff]  ;;  %s573_s11 = sshll.u32 %s926_s22, 7  ;;  %s268_s12 = scalar_lea.vmem [#allocation8], %s565_s14 }
  0x57   : > { %609 = vmatprep.subr.mxu1 %v872_v0  ;;  %641 = vmatprep.mubr.msk.f32.mxu1 %vm873_vm0, %v872_v0  ;;  %v373_v6 = vld [vmem:[#allocation7 + $0x68] sm:$0xff]  ;;  %v270_v7 = vld [vmem:[#allocation5] sm:$0xff]  ;;  %v269_v8 = vld [vmem:[%s234_s17] sm:$0xff]  ;;  %s468_s30 = sshll.u32 %s268_s12, 4  ;;  %s1071_s28 = scalar_lea.hbm %s1113_s5, %s573_s11  ;;  %s469_s30 = int_to_ptr.vmem [resolvable:$true] %s468_s30 }
  0x58   : > { %599 = vmatpush3.msra.mxu0 %v273_v1  ;;  %610 = vmatpush3.msra.mxu1 %v375_v3  ;;  %v372_v9 = vld [vmem:[#allocation7 + $0x60] sm:$0xff]  ;;  %v371_v10 = vld [vmem:[#allocation7 + $0x58] sm:$0xff]  ;;  %v370_v11 = vld [vmem:[#allocation7 + $0x50] sm:$0xff]  ;;  %s455_s7 = scalar_lea.sflag [#allocation4], %s1023_s13  ;;  %s797_s9 = scalar_lea.vmem %s469_s30, 128 }
  0x59   : > { %600 = vmatprep.subr.mxu0 %v872_v0  ;;  %611 = vmatprep.subr.mxu1 %v872_v0  ;;  %v369_v12 = vld [vmem:[#allocation7 + $0x48] sm:$0xff]  ;;  %v368_v13 = vld [vmem:[#allocation7 + $0x40] sm:$0xff]  ;;  %v367_v14 = vld [vmem:[#allocation7 + $0x38] sm:$0xff]  ;;  %p798_p11 = scmp.ne.s32.totalorder %s469_s30, %s797_s9  ;;  %p1129_p0 = scmp.ne.s32.totalorder %s1123_s23, 0 }
  0x5a   : > { %601 = vmatpush3.msra.mxu0 %v272_v2  ;;  %612 = vmatpush3.msra.mxu1 %v374_v5  ;;  %v366_v15 = vld [vmem:[#allocation7 + $0x30] sm:$0xff]  ;;  %v365_v16 = vld [vmem:[#allocation7 + $0x28] sm:$0xff]  ;;  %v364_v17 = vld [vmem:[#allocation7 + $0x20] sm:$0xff]  ;;  %s874_s22 = smov [#allocation8]  }
  0x5b   : > { %602 = vmatprep.subr.mxu0 %v872_v0  ;;  %613 = vmatprep.subr.mxu1 %v872_v0  ;;  %v363_v18 = vld [vmem:[#allocation7 + $0x18] sm:$0xff]  ;;  %v362_v19 = vld [vmem:[#allocation7 + $0x10] sm:$0xff]  ;;  %v361_v20 = vld [vmem:[#allocation7 + $0x8] sm:$0xff]  ;;  %p799_p1 = pnand %p798_p11, %p1129_p0  ;;  %s801_s16 = sshll.u32 %s874_s22, 4  ;;  %s802_s16 = int_to_ptr.vmem [resolvable:$false] %s801_s16 }
  0x5c   : > { %603 = vmatpush3.msra.mxu0 %v271_v4  ;;  %614 = vmatpush3.msra.mxu1 %v373_v6  ;;  %v360_v21 = vld [vmem:[#allocation7] sm:$0xff]  ;;  %v569_v22 = vld [vmem:[%s1110_s2] ss:$0 sm:$0xff]  ;;  %s803_s14 = scalar_lea.vmem %s802_s16, 256  ;;  %p804_p6 = scmp.lt.s32.totalorder %s469_s30, %s802_s16 }
  0x5d   : > { %604 = vmatprep.subr.mxu0 %v872_v0  ;;  %615 = vmatprep.subr.mxu1 %v872_v0  ;;  %v571_v31 = vld [vmem:[%s1112_s4] ss:$0 sm:$0xff]  ;;  %p800_p2 = pneg %p799_p1  ;;  %p805_p12 = scmp.lt.s32.totalorder %s803_s14, %s797_s9 }
  0x5e   : > { %605 = vmatpush3.msra.mxu0 %v270_v7  ;;  %616 = vmatpush3.msra.mxu1 %v372_v9 }
  0x5f   : > { %607 = vmatmul.mubr.msk.f32.vlgmr.msra.gmra.mxu0 %vm281_vm1, %v269_v8  ;;  %617 = vmatprep.subr.mxu1 %v872_v0  ;;  %p806_p7 = por %p805_p12, %p804_p6 }
  0x60   : > { %618 = vmatpush3.msra.mxu1 %v371_v10 }
  0x61   : > { %619 = vmatprep.subr.mxu1 %v872_v0  ;;  %p807_p9 = pnand %p806_p7, %p800_p2 }
  0x62   : > { %620 = vmatpush3.msra.mxu1 %v370_v11 }
  0x63   : > { %621 = vmatprep.subr.mxu1 %v872_v0 }
  0x64   : > { %622 = vmatpush3.msra.mxu1 %v369_v12 }
  0x65   : > { %623 = vmatprep.subr.mxu1 %v872_v0 }
  0x66   : > { %624 = vmatpush3.msra.mxu1 %v368_v13 }
  0x67   : > { %625 = vmatprep.subr.mxu1 %v872_v0 }
  0x68   : > { %626 = vmatpush3.msra.mxu1 %v367_v14 }
  0x69   : > { %627 = vmatprep.subr.mxu1 %v872_v0 }
  0x6a   : > { %628 = vmatpush3.msra.mxu1 %v366_v15 }
  0x6b   : > { %629 = vmatprep.subr.mxu1 %v872_v0 }
  0x6c   : > { %630 = vmatpush3.msra.mxu1 %v365_v16 }
  0x6d   : > { %631 = vmatprep.subr.mxu1 %v872_v0 }
  0x6e   : > { %632 = vmatpush3.msra.mxu1 %v364_v17 }
  0x6f   : > { %633 = vmatprep.subr.mxu1 %v872_v0 }
  0x70   : > { %634 = vmatpush3.msra.mxu1 %v363_v18 }
  0x71   : > { %635 = vmatprep.subr.mxu1 %v872_v0 }
  0x72   : > { %636 = vmatpush3.msra.mxu1 %v362_v19 }
  0x73   : > { %637 = vmatprep.subr.mxu1 %v872_v0 }
  0x74   : > { %638 = vmatpush3.msra.mxu1 %v361_v20 }
  0x75   : > { %639 = vmatprep.subr.mxu1 %v872_v0 }
  0x76   : > { %640 = vmatpush3.msra.mxu1 %v360_v21 }
 0x11f   : > { %v351_v23 = vpop.f32.mrf.mxu0 }
 0x120   : > { %v352_v24 = vadd.f32 %v569_v22, %v351_v23 }
 0x121   : > { %v608_v25 = vpop.f32.mrf.mxu0 }
 0x122   : > { %v356_v26 = vmul.f32 0.70710677, %v352_v24  ;;  %v355_v28 = vmul.f32 0.5, %v352_v24 }
 0x124   : > { %715 = verf.f32 %v356_v26 }
 0x131   : > { %v716_v27 = vpop.eup %715 }
 0x132   : > { %v358_v29 = vadd.f32 1.0, %v716_v27 }
 0x134   : > { %v359_v30 = vmul.f32 %v358_v29, %v355_v28 }
 0x136   : > { %642 = vmatmul.mubr.f32.vlgmr.msra.gmra.mxu1 %v359_v30 }
 0x1f6   : > { %v449_v32 = vpop.f32.mrf.mxu1 }
 0x1f7   : > { %v450_v33 = vadd.f32 %v571_v31, %v449_v32 }
 0x1f8   : > { %v643_v34 = vpop.f32.mrf.mxu1 }
 0x1f9   : > { %453 = vst [vmem:[%s268_s12] sm:$0xff] %v450_v33 }
 0x1fa   : > { %810 = shalt.err (!%p807_p9)
}
 0x1fb   : > { %s811_s17 = scalar_lea.hbm %s1071_s28, 128  ;;  %s815_s26 = scalar_lea.hbm %s1113_s5, 256 }
 0x1fc   : > { %p812_p13 = scmp.ne.s32.totalorder %s1071_s28, %s811_s17  ;;  %p816_p4 = scmp.lt.s32.totalorder %s1071_s28, %s1113_s5 }
 0x1fd   : > { %p817_p8 = scmp.lt.s32.totalorder %s815_s26, %s811_s17 }
 0x1fe   : > { %p813_p5 = pnand %p812_p13, %p1129_p0 }
 0x1ff   : > { %p818_p3 = por %p817_p8, %p816_p4 }
 0x200   : > { %p814_p10 = pneg %p813_p5 }
 0x202   : > { %p819_p11 = pnand %p818_p3, %p814_p10 }
 0x204   : > { %822 = shalt.err (!%p819_p11)
}
 0x205   : > { %654 = dma.vmem_to_hbm [thread:$0]  (%p1129_p0), %s469_s30, 128, %s1071_s28, %s455_s7  }
 0x206 PF: > { %s480_s11 = sand.u32 1, %s853_s18   ;;  %p1130_p1 = scmp.ne.s32.totalorder %s1119_s25, 0 }
 0x207   : > { %p1131_p2 = scmp.ge.s32.totalorder %s865_s21, 2  ;;  %s481_s12 = scalar_lea.sflag [#allocation4], %s480_s11 }
 0x209   : > { %p668_p6 = pnand %p1131_p2, %p1130_p1 }
 0x20b   : > { %p669_p12 = pneg %p668_p6 }
 0x20d   : > { %848 = dma.done.wait (%p669_p12), %s481_s12, 128  }
 0x20e   : > { %850 = vsyncadd (%p669_p12), %s481_s12, 4294967168  ;;  %p19_p7 = scmp.ge.s32.totalorder %s977_s15, 4   ;;  %s1132_s18 = smov %s857_s19 }
 0x20f   : > { %s1133_s19 = smov %s861_s20  ;;  %s1134_s20 = smov %s993_s27 }
 0x210   : > { %s1135_s21 = smov %s977_s15  ;;  %21 = sbr.rel (!%p19_p7) target bundleno = 6 (0x6), region = 93 }
 0x215   :  { %486 = vsyncpa [#allocation3], 1 }
 0x216   :  { %488 = vsyncpa [#allocation3 + $0x1], 1 }
 0x217   :  { %489 = vsyncpa [#allocation6], 1 }
 0x218   :  { %490 = vsyncpa [#allocation4], 1 }
 0x219   :  { %492 = vsyncpa [#allocation4 + $0x1], 1 }

// kernel: tpu_custom_call.1
= control target key start
LH: loop header
LB: loop body
LE: loop exit
PB: predicated region body
PF: predicated region fallthrough
CT: control target
= control target key end

     0   :  { %10 = vsyncpa [#allocation3], 0  ;;  %s1108_s0 = inlined_call_operand.hbm [shape: f32[16,32], index: 0, kind: input, shape index: {}]   ;;  %s1109_s1 = inlined_call_operand.hbm [shape: f32[32,128], index: 1, kind: input, shape index: {}]   ;;  %s1110_s2 = inlined_call_operand.vmem [shape: f32[1,128], index: 2, kind: input, shape index: {}]   ;;  %s1111_s3 = inlined_call_operand.hbm [shape: f32[128,128], index: 3, kind: input, shape index: {}]   ;;  %s1112_s4 = inlined_call_operand.vmem [shape: f32[1,128], index: 4, kind: input, shape index: {}]   ;;  %s1113_s5 = inlined_call_operand.hbm [shape: f32[16,128], index: 5, kind: output, shape index: {}]  }
   0x1   :  { %12 = vsyncpa [#allocation3 + $0x1], 0 }
   0x2   :  { %13 = vsyncpa [#allocation6], 0 }
   0x3   :  { %14 = vsyncpa [#allocation4], 0 }
   0x4   :  { %16 = vsyncpa [#allocation4 + $0x1], 0  ;;  %s905_s18 = smov 0   ;;  %s907_s19 = smov 0  }
   0x5   :  { %s909_s20 = smov 0   ;;  %s911_s21 = smov 0  }
   0x6 LB: > { %s926_s22 = sadd.s32 4294967295, %s865_s21   ;;  %s557_s23 = sadd.s32 4294967294, %s865_s21   ;;  %s865_s21 = sphi %s911_s21, %s1135_s21   ;;  %s861_s20 = sphi %s909_s20, %s1134_s20   ;;  %s857_s19 = sphi %s907_s19, %s1133_s19   ;;  %s853_s18 = sphi %s905_s18, %s1132_s18  }
   0x7   : > { %p42_p0 = scmp.ne.s32.totalorder %s857_s19, %s853_s18  ;;  %p1114_p1 = scmp.eq.s32.totalorder %s926_s22, 0 }
   0x8   : > { %p156_p3 = scmp.eq.s32.totalorder %s557_s23, 1  ;;  %p558_p5 = scmp.ge.s32.totalorder %s865_s21, 1 }
   0x9   : > { %p935_p4 = por %p1114_p1, %p42_p0  ;;  %p163_p7 = scmp.lt.s32.totalorder %s865_s21, 3 }
   0xa   : > { %p940_p6 = por %p156_p3, %p42_p0  ;;  %s867_s27 = smov [#allocation5]  }
   0xb   : > { %s1118_s24 = scalar_select %p935_p4, 1, 0 }
   0xc   : > { %s1119_s25 = scalar_select %p940_p6, 1, 0 }
   0xd   : > { %p945_p8 = pnand %p558_p5, %p163_p7  ;;  %s175_s28 = sshll.u32 %s867_s27, 4  ;;  %s176_s28 = int_to_ptr.vmem [resolvable:$true] %s175_s28 }
   0xe   : > { %s868_s30 = smov [#allocation7]   ;;  %s728_s7 = scalar_lea.vmem %s176_s28, 512 }
   0xf   : > { %s1120_s26 = scalar_select %p945_p8, 1, 0 }
  0x10   : > { %p656_p9 = pneg %p945_p8  ;;  %s191_s6 = sshll.u32 %s868_s30, 4  ;;  %s192_s6 = int_to_ptr.vmem [resolvable:$true] %s191_s6 }
  0x11   : > { %p729_p13 = scmp.ne.s32.totalorder %s176_s28, %s728_s7  ;;  %p736_p5 = scmp.lt.s32.totalorder %s176_s28, %s176_s28 }
  0x12   : > { %p954_p11 = pnand %p656_p9, %p1114_p1  ;;  %p737_p7 = scmp.lt.s32.totalorder %s728_s7, %s728_s7 }
  0x14   : > { %p719_p12 = pneg %p954_p11  ;;  %p738_p10 = por %p737_p7, %p736_p5 }
  0x16   : > { %p731_p0 = pnand %p729_p13, %p719_p12 }
  0x18   : > { %p732_p3 = pneg %p731_p0 }
  0x1a   : > { %p739_p9 = pnand %p738_p10, %p732_p3 }
  0x1c   : > { %742 = shalt.err (!%p739_p9)
}
  0x1d   : > { %s869_s8 = smov 128   ;;  %s870_s9 = smov 8  }
  0x1e   : > { %659 = dma.hbm_to_vmem [thread:$0]  (!%p954_p11), %s1109_s1, 512, %s176_s28, [#allocation6], %s869_s8, %s869_s8, %s870_s9  }
  0x1f   : > { %s754_s12 = scalar_lea.vmem %s192_s6, 2048  ;;  %p762_p2 = scmp.lt.s32.totalorder %s192_s6, %s192_s6 }
  0x20   : > { %p755_p1 = scmp.ne.s32.totalorder %s192_s6, %s754_s12  ;;  %p763_p6 = scmp.lt.s32.totalorder %s754_s12, %s754_s12 }
  0x22   : > { %p757_p13 = pnand %p755_p1, %p719_p12  ;;  %p764_p5 = por %p763_p6, %p762_p2 }
  0x24   : > { %p758_p0 = pneg %p757_p13 }
  0x26   : > { %p765_p10 = pnand %p764_p5, %p758_p0 }
  0x28   : > { %768 = shalt.err (!%p765_p10)
}
  0x29   : > { %662 = dma.hbm_to_vmem [thread:$0]  (!%p954_p11), %s1111_s3, 2048, %s192_s6, [#allocation6], %s869_s8, %s869_s8, %s870_s9  }
  0x2a   : > { %s977_s15 = sadd.s32 1, %s865_s21   ;;  %s29_s16 = sadd.s32 1, %s861_s20 }
  0x2b   : > { %s26_s17 = ssub.s32 %s865_s21, %s977_s15  ;;  %p36_p1 = scmp.ne.s32.totalorder %s861_s20, %s857_s19 }
  0x2c   : > { %p27_p2 = scmp.eq.s32.totalorder %s26_s17, 0  ;;  %p37_p6 = scmp.eq.s32.totalorder %s865_s21, 0 }
  0x2d   : > { %p1122_p12 = scmp.eq.s32.totalorder %s926_s22, 1  ;;  %p673_p7 = scmp.lt.s32.totalorder %s865_s21, 2 }
  0x2e   : > { %s993_s27 = scalar_select %p27_p2, %s861_s20, %s29_s16  }
  0x2f   : > { %p987_p3 = por %p1122_p12, %p36_p1  ;;  %p38_p9 = por %p37_p6, %p36_p1 }
  0x30   : > { %s208_s28 = sand.u32 1, %s861_s20   ;;  %s563_s30 = sshll.u32 %s865_s21, 7 }
  0x31   : > { %s1123_s23 = scalar_select %p987_p3, 1, 0 }
  0x32   : > { %s562_s29 = sshll.u32 %s208_s28, 3  ;;  %s1000_s8 = scalar_lea.hbm %s1108_s0, %s563_s30 }
  0x33   : > { %s212_s9 = scalar_lea.vmem [#allocation2], %s562_s29  ;;  %p1002_p11 = pnand %p673_p7, %p38_p9 }
  0x34   : > { %s219_s10 = sshll.u32 %s212_s9, 4  ;;  %s209_s12 = scalar_lea.sflag [#allocation3], %s208_s28  ;;  %s220_s10 = int_to_ptr.vmem [resolvable:$true] %s219_s10 }
  0x35   : > { %s769_s13 = scalar_lea.hbm %s1000_s8, 128  ;;  %p771_p0 = pneg %p1002_p11 }
  0x36   : > { %p770_p13 = scmp.ne.s32.totalorder %s1000_s8, %s769_s13  ;;  %s774_s17 = scalar_lea.hbm %s1108_s0, 256 }
  0x37   : > { %p775_p1 = scmp.lt.s32.totalorder %s1000_s8, %s1108_s0  ;;  %p776_p2 = scmp.lt.s32.totalorder %s774_s17, %s769_s13 }
  0x38   : > { %p772_p5 = pnand %p771_p0, %p770_p13 }
  0x39   : > { %p777_p6 = por %p776_p2, %p775_p1 }
  0x3a   : > { %p773_p10 = pneg %p772_p5 }
  0x3c   : > { %p778_p12 = pnand %p777_p6, %p773_p10 }
  0x3e   : > { %781 = shalt.err (!%p778_p12)
}
  0x3f   : > { %s782_s6 = scalar_lea.vmem %s220_s10, 128  ;;  %s871_s28 = smov [#allocation2]  }
  0x40   : > { %p783_p7 = scmp.ne.s32.totalorder %s220_s10, %s782_s6  ;;  %s787_s7 = sshll.u32 %s871_s28, 4  ;;  %s788_s7 = int_to_ptr.vmem [resolvable:$false] %s787_s7 }
  0x41   : > { %s789_s9 = scalar_lea.vmem %s788_s7, 256  ;;  %p790_p13 = scmp.lt.s32.totalorder %s220_s10, %s788_s7 }
  0x42   : > { %p785_p9 = pnand %p783_p7, %p771_p0  ;;  %p791_p5 = scmp.lt.s32.totalorder %s789_s9, %s782_s6 }
  0x44   : > { %p786_p3 = pneg %p785_p9  ;;  %p792_p4 = por %p791_p5, %p790_p13 }
  0x46   : > { %p793_p8 = pnand %p792_p4, %p786_p3 }
  0x48   : > { %796 = shalt.err (!%p793_p8)
}
  0x49   : > { %666 = dma.hbm_to_vmem [thread:$0]  (!%p1002_p11), %s1000_s8, 128, %s220_s10, %s209_s12  }
  0x4a   : > { %p1125_p10 = scmp.ne.s32.totalorder %s1120_s26, 0 }
  0x4b   : > { %s1023_s13 = sand.u32 (!%p1125_p10), 1, %s857_s19   ;;  %p1126_p4 = scmp.ne.s32.totalorder (!%p1125_p10), %s1118_s24, 0 }
  0x4c   : > { %228 = sbr.rel (%p1125_p10) target bundleno = 518 (0x206), region = 40  ;;  %s565_s14 = sshll.u32 (!%p1125_p10), %s1023_s13, 3 }
  0x4d   : > { %s231_s16 = scalar_lea.sflag (!%p1125_p10), [#allocation3], %s1023_s13  ;;  %s234_s17 = scalar_lea.vmem (!%p1125_p10), [#allocation2], %s565_s14 }
  0x51   : > { %840 = dma.done.wait (%p1126_p4), %s231_s16, 128  }
  0x52   : > { %842 = vsyncadd (%p1126_p4), %s231_s16, 4294967168  ;;  %p1127_p8 = scmp.eq.s32.totalorder %s926_s22, 0 }
  0x54   : > { %844 = dma.done.wait (%p1127_p8), [#allocation6], 2560   ;;  %p1128_p3 = pmov %p1127_p8 }
  0x55   : > { %v872_v0 = vmov 0.0   ;;  %vm873_vm0 = vmmov 0   ;;  %v273_v1 = vld [vmem:[#allocation5 + $0x18] sm:$0xff]  ;;  %v272_v2 = vld [vmem:[#allocation5 + $0x10] sm:$0xff]  ;;  %v271_v4 = vld [vmem:[#allocation5 + $0x8] sm:$0xff]  ;;  %vm281_vm1 = vcmask 261120  }
  0x56   : > { %846 = vsyncadd (%p1128_p3), [#allocation6], 4294964736  ;;  %598 = vmatprep.subr.mxu0 %v872_v0  ;;  %606 = vmatprep.mubr.msk.f32.mxu0 %vm873_vm0, %v872_v0  ;;  %v375_v3 = vld [vmem:[#allocation7 + $0x78] sm:$0xff]  ;;  %v374_v5 = vld [vmem:[#allocation7 + $0x70] sm:$0xff]  ;;  %s573_s11 = sshll.u32 %s926_s22, 7  ;;  %s268_s12 = scalar_lea.vmem [#allocation8], %s565_s14 }
  0x57   : > { %609 = vmatprep.subr.mxu1 %v872_v0  ;;  %641 = vmatprep.mubr.msk.f32.mxu1 %vm873_vm0, %v872_v0  ;;  %v373_v6 = vld [vmem:[#allocation7 + $0x68] sm:$0xff]  ;;  %v270_v7 = vld [vmem:[#allocation5] sm:$0xff]  ;;  %v269_v8 = vld [vmem:[%s234_s17] sm:$0xff]  ;;  %s468_s30 = sshll.u32 %s268_s12, 4  ;;  %s1071_s28 = scalar_lea.hbm %s1113_s5, %s573_s11  ;;  %s469_s30 = int_to_ptr.vmem [resolvable:$true] %s468_s30 }
  0x58   : > { %599 = vmatpush3.msra.mxu0 %v273_v1  ;;  %610 = vmatpush3.msra.mxu1 %v375_v3  ;;  %v372_v9 = vld [vmem:[#allocation7 + $0x60] sm:$0xff]  ;;  %v371_v10 = vld [vmem:[#allocation7 + $0x58] sm:$0xff]  ;;  %v370_v11 = vld [vmem:[#allocation7 + $0x50] sm:$0xff]  ;;  %s455_s7 = scalar_lea.sflag [#allocation4], %s1023_s13  ;;  %s797_s9 = scalar_lea.vmem %s469_s30, 128 }
  0x59   : > { %600 = vmatprep.subr.mxu0 %v872_v0  ;;  %611 = vmatprep.subr.mxu1 %v872_v0  ;;  %v369_v12 = vld [vmem:[#allocation7 + $0x48] sm:$0xff]  ;;  %v368_v13 = vld [vmem:[#allocation7 + $0x40] sm:$0xff]  ;;  %v367_v14 = vld [vmem:[#allocation7 + $0x38] sm:$0xff]  ;;  %p798_p11 = scmp.ne.s32.totalorder %s469_s30, %s797_s9  ;;  %p1129_p0 = scmp.ne.s32.totalorder %s1123_s23, 0 }
  0x5a   : > { %601 = vmatpush3.msra.mxu0 %v272_v2  ;;  %612 = vmatpush3.msra.mxu1 %v374_v5  ;;  %v366_v15 = vld [vmem:[#allocation7 + $0x30] sm:$0xff]  ;;  %v365_v16 = vld [vmem:[#allocation7 + $0x28] sm:$0xff]  ;;  %v364_v17 = vld [vmem:[#allocation7 + $0x20] sm:$0xff]  ;;  %s874_s22 = smov [#allocation8]  }
  0x5b   : > { %602 = vmatprep.subr.mxu0 %v872_v0  ;;  %613 = vmatprep.subr.mxu1 %v872_v0  ;;  %v363_v18 = vld [vmem:[#allocation7 + $0x18] sm:$0xff]  ;;  %v362_v19 = vld [vmem:[#allocation7 + $0x10] sm:$0xff]  ;;  %v361_v20 = vld [vmem:[#allocation7 + $0x8] sm:$0xff]  ;;  %p799_p1 = pnand %p798_p11, %p1129_p0  ;;  %s801_s16 = sshll.u32 %s874_s22, 4  ;;  %s802_s16 = int_to_ptr.vmem [resolvable:$false] %s801_s16 }
  0x5c   : > { %603 = vmatpush3.msra.mxu0 %v271_v4  ;;  %614 = vmatpush3.msra.mxu1 %v373_v6  ;;  %v360_v21 = vld [vmem:[#allocation7] sm:$0xff]  ;;  %v569_v22 = vld [vmem:[%s1110_s2] ss:$0 sm:$0xff]  ;;  %s803_s14 = scalar_lea.vmem %s802_s16, 256  ;;  %p804_p6 = scmp.lt.s32.totalorder %s469_s30, %s802_s16 }
  0x5d   : > { %604 = vmatprep.subr.mxu0 %v872_v0  ;;  %615 = vmatprep.subr.mxu1 %v872_v0  ;;  %v571_v31 = vld [vmem:[%s1112_s4] ss:$0 sm:$0xff]  ;;  %p800_p2 = pneg %p799_p1  ;;  %p805_p12 = scmp.lt.s32.totalorder %s803_s14, %s797_s9 }
  0x5e   : > { %605 = vmatpush3.msra.mxu0 %v270_v7  ;;  %616 = vmatpush3.msra.mxu1 %v372_v9 }
  0x5f   : > { %607 = vmatmul.mubr.msk.f32.vlgmr.msra.gmra.mxu0 %vm281_vm1, %v269_v8  ;;  %617 = vmatprep.subr.mxu1 %v872_v0  ;;  %p806_p7 = por %p805_p12, %p804_p6 }
  0x60   : > { %618 = vmatpush3.msra.mxu1 %v371_v10 }
  0x61   : > { %619 = vmatprep.subr.mxu1 %v872_v0  ;;  %p807_p9 = pnand %p806_p7, %p800_p2 }
  0x62   : > { %620 = vmatpush3.msra.mxu1 %v370_v11 }
  0x63   : > { %621 = vmatprep.subr.mxu1 %v872_v0 }
  0x64   : > { %622 = vmatpush3.msra.mxu1 %v369_v12 }
  0x65   : > { %623 = vmatprep.subr.mxu1 %v872_v0 }
  0x66   : > { %624 = vmatpush3.msra.mxu1 %v368_v13 }
  0x67   : > { %625 = vmatprep.subr.mxu1 %v872_v0 }
  0x68   : > { %626 = vmatpush3.msra.mxu1 %v367_v14 }
  0x69   : > { %627 = vmatprep.subr.mxu1 %v872_v0 }
  0x6a   : > { %628 = vmatpush3.msra.mxu1 %v366_v15 }
  0x6b   : > { %629 = vmatprep.subr.mxu1 %v872_v0 }
  0x6c   : > { %630 = vmatpush3.msra.mxu1 %v365_v16 }
  0x6d   : > { %631 = vmatprep.subr.mxu1 %v872_v0 }
  0x6e   : > { %632 = vmatpush3.msra.mxu1 %v364_v17 }
  0x6f   : > { %633 = vmatprep.subr.mxu1 %v872_v0 }
  0x70   : > { %634 = vmatpush3.msra.mxu1 %v363_v18 }
  0x71   : > { %635 = vmatprep.subr.mxu1 %v872_v0 }
  0x72   : > { %636 = vmatpush3.msra.mxu1 %v362_v19 }
  0x73   : > { %637 = vmatprep.subr.mxu1 %v872_v0 }
  0x74   : > { %638 = vmatpush3.msra.mxu1 %v361_v20 }
  0x75   : > { %639 = vmatprep.subr.mxu1 %v872_v0 }
  0x76   : > { %640 = vmatpush3.msra.mxu1 %v360_v21 }
 0x11f   : > { %v351_v23 = vpop.f32.mrf.mxu0 }
 0x120   : > { %v352_v24 = vadd.f32 %v569_v22, %v351_v23 }
 0x121   : > { %v608_v25 = vpop.f32.mrf.mxu0 }
 0x122   : > { %v356_v26 = vmul.f32 0.70710677, %v352_v24  ;;  %v355_v28 = vmul.f32 0.5, %v352_v24 }
 0x124   : > { %715 = verf.f32 %v356_v26 }
 0x131   : > { %v716_v27 = vpop.eup %715 }
 0x132   : > { %v358_v29 = vadd.f32 1.0, %v716_v27 }
 0x134   : > { %v359_v30 = vmul.f32 %v358_v29, %v355_v28 }
 0x136   : > { %642 = vmatmul.mubr.f32.vlgmr.msra.gmra.mxu1 %v359_v30 }
 0x1f6   : > { %v449_v32 = vpop.f32.mrf.mxu1 }
 0x1f7   : > { %v450_v33 = vadd.f32 %v571_v31, %v449_v32 }
 0x1f8   : > { %v643_v34 = vpop.f32.mrf.mxu1 }
 0x1f9   : > { %453 = vst [vmem:[%s268_s12] sm:$0xff] %v450_v33 }
 0x1fa   : > { %810 = shalt.err (!%p807_p9)
}
 0x1fb   : > { %s811_s17 = scalar_lea.hbm %s1071_s28, 128  ;;  %s815_s26 = scalar_lea.hbm %s1113_s5, 256 }
 0x1fc   : > { %p812_p13 = scmp.ne.s32.totalorder %s1071_s28, %s811_s17  ;;  %p816_p4 = scmp.lt.s32.totalorder %s1071_s28, %s1113_s5 }
 0x1fd   : > { %p817_p8 = scmp.lt.s32.totalorder %s815_s26, %s811_s17 }
 0x1fe   : > { %p813_p5 = pnand %p812_p13, %p1129_p0 }
 0x1ff   : > { %p818_p3 = por %p817_p8, %p816_p4 }
 0x200   : > { %p814_p10 = pneg %p813_p5 }
 0x202   : > { %p819_p11 = pnand %p818_p3, %p814_p10 }
 0x204   : > { %822 = shalt.err (!%p819_p11)
}
 0x205   : > { %654 = dma.vmem_to_hbm [thread:$0]  (%p1129_p0), %s469_s30, 128, %s1071_s28, %s455_s7  }
 0x206 PF: > { %s480_s11 = sand.u32 1, %s853_s18   ;;  %p1130_p1 = scmp.ne.s32.totalorder %s1119_s25, 0 }
 0x207   : > { %p1131_p2 = scmp.ge.s32.totalorder %s865_s21, 2  ;;  %s481_s12 = scalar_lea.sflag [#allocation4], %s480_s11 }
 0x209   : > { %p668_p6 = pnand %p1131_p2, %p1130_p1 }
 0x20b   : > { %p669_p12 = pneg %p668_p6 }
 0x20d   : > { %848 = dma.done.wait (%p669_p12), %s481_s12, 128  }
 0x20e   : > { %850 = vsyncadd (%p669_p12), %s481_s12, 4294967168  ;;  %p19_p7 = scmp.ge.s32.totalorder %s977_s15, 4   ;;  %s1132_s18 = smov %s857_s19 }
 0x20f   : > { %s1133_s19 = smov %s861_s20  ;;  %s1134_s20 = smov %s993_s27 }
 0x210   : > { %s1135_s21 = smov %s977_s15  ;;  %21 = sbr.rel (!%p19_p7) target bundleno = 6 (0x6), region = 93 }
 0x215   :  { %486 = vsyncpa [#allocation3], 1 }
 0x216   :  { %488 = vsyncpa [#allocation3 + $0x1], 1 }
 0x217   :  { %489 = vsyncpa [#allocation6], 1 }
 0x218   :  { %490 = vsyncpa [#allocation4], 1 }
 0x219   :  { %492 = vsyncpa [#allocation4 + $0x1], 1 }

</bundles_post_ra>
